<compile_context>
chip_gen: v7x
topology: tpu7x:2x2x1
jax: 0.10.0
libtpu: 0.0.40
codegen_flags: <defaults>
</compile_context>

<pallas_src>
import jax
import jax.numpy as jnp
from jax.experimental import pallas as pl
from jax.experimental.pallas import tpu as pltpu

HIDDEN = 128
TILE_B = 2048    # max rows per grid step (multiple of 8); ~5 MiB peak VMEM/step
MIN_STEPS = 8    # keep >= this many grid steps when B is large (v7x megacore + pipelining)


def _round_up(n, m):
    return ((n + m - 1) // m) * m


def count_encoder_kernel(x_ref, wb_ref, w2_ref, o_ref):
    # x_ref:  (tb, 1)          f32
    # wb_ref: (8, HIDDEN)      f32  row0 = fc1.weight.T, row1 = fc1.bias, row2 = fc2.bias
    # w2_ref: (HIDDEN, HIDDEN) bf16 (= fc2.weight.T)
    x = x_ref[...]                                       # (tb, 1) f32
    w1 = wb_ref[0:1, :]                                  # (1, H) f32
    b1 = wb_ref[1:2, :]                                  # (1, H) f32
    b2 = wb_ref[2:3, :]                                  # (1, H) f32
    h = jnp.maximum(x * w1 + b1, 0.0)                    # broadcast -> (tb, H), VPU f32
    out = jnp.dot(h.astype(jnp.bfloat16), w2_ref[...],
                  preferred_element_type=jnp.float32)    # (tb, H) bf16 MXU, f32 acc
    o_ref[...] = (out + b2).astype(o_ref.dtype)


def count_input_encoder(x, w1, b1, w2, b2, *, tile_b=TILE_B, min_steps=MIN_STEPS):
    """x: (B, 1) float32. w1/b1/b2: (1, 128); w2: (128, 128). Returns (B, 128) float32."""
    B = x.shape[0]
    if B == 0:                                           # empty-batch guard
        return jnp.zeros((0, HIDDEN), jnp.float32)

    # Pad only to a multiple of 8 rows (sublane quantum); ragged last tile handles the rest.
    Bp = _round_up(B, 8)
    if Bp != B:
        x = jnp.pad(x, ((0, Bp - B), (0, 0)))            # zero rows -> sliced off below

    # Tile: as large as possible (amortize per-step overhead toward the HBM roofline),
    # but keep >= min_steps grid steps so megacore/pipelining have work, and never > Bp.
    tb = max(8, min(tile_b, _round_up(pl.cdiv(Bp, min_steps), 8), Bp))
    grid_b = pl.cdiv(Bp, tb)                             # ragged last tile allowed

    # Pack the three small parameter vectors into one resident (8, HIDDEN) operand.
    wb = jnp.zeros((8, HIDDEN), jnp.float32)
    wb = wb.at[0].set(w1.reshape(HIDDEN))
    wb = wb.at[1].set(b1.reshape(HIDDEN))
    wb = wb.at[2].set(b2.reshape(HIDDEN))

    w2_bf16 = w2.astype(jnp.bfloat16)                    # halve resident w2 VMEM + its DMA

    out = pl.pallas_call(
        count_encoder_kernel,
        out_shape=jax.ShapeDtypeStruct((Bp, HIDDEN), jnp.float32),
        grid=(grid_b,),
        in_specs=[
            pl.BlockSpec((tb, 1), lambda i: (i, 0)),            # x: tiled over batch
            pl.BlockSpec((8, HIDDEN), lambda i: (0, 0)),        # packed w1/b1/b2: resident
            pl.BlockSpec((HIDDEN, HIDDEN), lambda i: (0, 0)),   # w2: resident
        ],
        out_specs=pl.BlockSpec((tb, HIDDEN), lambda i: (i, 0)),
        compiler_params=pltpu.CompilerParams(
            dimension_semantics=("parallel",),                  # megacore on v7x
            vmem_limit_bytes=32 * 1024 * 1024,                  # raise v5e's 16 MiB default
        ),
        cost_estimate=pl.CostEstimate(
            flops=2 * grid_b * tb * HIDDEN * HIDDEN + 3 * grid_b * tb * HIDDEN,
            transcendentals=0,
            bytes_accessed=4 * grid_b * tb                      # x
            + 4 * Bp * HIDDEN                                   # out (dominant)
            + 2 * HIDDEN * HIDDEN                               # w2 (bf16)
            + 4 * 8 * HIDDEN,                                   # packed w1/b1/b2
        ),
    )(x, wb, w2_bf16)

    return out[:B] if Bp != B else out


def init_params():
    # Deterministic synthetic parameters (PyTorch-like uniform init ranges).
    k = jax.random.PRNGKey(42)
    k1, k2, k3, k4 = jax.random.split(k, 4)
    bound1 = 1.0  # 1/sqrt(in_features=1)
    w1 = jax.random.uniform(k1, (1, HIDDEN), jnp.float32, -bound1, bound1)
    b1 = jax.random.uniform(k2, (1, HIDDEN), jnp.float32, -bound1, bound1)
    bound2 = 1.0 / jnp.sqrt(float(HIDDEN))
    w2 = jax.random.uniform(k3, (HIDDEN, HIDDEN), jnp.float32, -bound2, bound2)
    b2 = jax.random.uniform(k4, (1, HIDDEN), jnp.float32, -bound2, bound2)
    return w1, b1, w2, b2


if __name__ == "__main__":
    B = 83  # small batch, not a multiple of 8 -> exercises pad-to-8 + ragged last tile
    key = jax.random.PRNGKey(0)
    x = jax.random.normal(key, (B, 1), jnp.float32)

    w1, b1, w2, b2 = init_params()

    out = count_input_encoder(x, w1, b1, w2, b2)
    out = jax.block_until_ready(out)

    # Reference check in plain JAX (f32); tolerance loosened for bf16 MXU operands.
    h_ref = jnp.maximum(x @ w1 + b1, 0.0)
    ref = h_ref @ w2 + b2
    assert out.shape == (B, HIDDEN)
    assert jnp.allclose(out, ref, atol=5e-2, rtol=5e-2)

    print("KERNEL_OK")
</pallas_src>

<mosaic_0001>
module attributes {stable_mosaic.version = 11 : i64} {
  func.func @count_encoder_kernel(%arg0: i32, %arg1: memref<16x1xf32, #tpu.memory_space<vmem>>, %arg2: memref<8x128xf32, #tpu.memory_space<vmem>>, %arg3: memref<128x128xbf16, #tpu.memory_space<vmem>>, %arg4: memref<16x128xf32, #tpu.memory_space<vmem>>) attributes {dimension_semantics = [#tpu.dimension_semantics<parallel>], iteration_bounds = array<i64: 6>, scalar_prefetch = 0 : i64, scratch_operands = 0 : i64, tpu.core_type = #tpu.core_type<tc>, window_params = [{transform_indices = @transform_0, window_bounds = array<i64: 16, 1>}, {pipeline_mode = #tpu.pipeline_mode<synchronous>, transform_indices = @transform_1, window_bounds = array<i64: 8, 128>}, {pipeline_mode = #tpu.pipeline_mode<synchronous>, transform_indices = @transform_2, window_bounds = array<i64: 128, 128>}, {transform_indices = @transform_3, window_bounds = array<i64: 16, 128>}]} {
    %c0 = arith.constant 0 : index
    %c0_0 = arith.constant 0 : index
    %0 = vector.load %arg1[%c0, %c0_0] : memref<16x1xf32, #tpu.memory_space<vmem>>, vector<16x1xf32>
    %c0_1 = arith.constant 0 : index
    %c0_2 = arith.constant 0 : index
    %1 = vector.load %arg2[%c0_1, %c0_2] : memref<8x128xf32, #tpu.memory_space<vmem>>, vector<1x128xf32>
    %c1 = arith.constant 1 : index
    %c0_3 = arith.constant 0 : index
    %2 = vector.load %arg2[%c1, %c0_3] : memref<8x128xf32, #tpu.memory_space<vmem>>, vector<1x128xf32>
    %c2 = arith.constant 2 : index
    %c0_4 = arith.constant 0 : index
    %3 = vector.load %arg2[%c2, %c0_4] : memref<8x128xf32, #tpu.memory_space<vmem>>, vector<1x128xf32>
    %4 = vector.broadcast %0 : vector<16x1xf32> to vector<16x128xf32>
    %5 = vector.broadcast %1 : vector<1x128xf32> to vector<16x128xf32>
    %6 = arith.mulf %4, %5 : vector<16x128xf32>
    %7 = vector.broadcast %2 : vector<1x128xf32> to vector<16x128xf32>
    %8 = arith.addf %6, %7 : vector<16x128xf32>
    %cst = arith.constant 0.000000e+00 : f32
    %9 = vector.broadcast %cst : f32 to vector<16x128xf32>
    %10 = arith.maximumf %8, %9 : vector<16x128xf32>
    %11 = arith.truncf %10 : vector<16x128xf32> to vector<16x128xbf16>
    %c0_5 = arith.constant 0 : index
    %c0_6 = arith.constant 0 : index
    %12 = vector.load %arg3[%c0_5, %c0_6] : memref<128x128xbf16, #tpu.memory_space<vmem>>, vector<128x128xbf16>
    %cst_7 = arith.constant dense<0.000000e+00> : vector<16x128xf32>
    %13 = tpu.matmul %11, %12, %cst_7 {dimension_numbers = #tpu.dot_dimension_numbers<[1], [0], [0], [1], [0, 0, 1, 1], [], []>} : vector<16x128xbf16>, vector<128x128xbf16>, vector<16x128xf32> -> vector<16x128xf32>
    %14 = vector.broadcast %3 : vector<1x128xf32> to vector<16x128xf32>
    %15 = arith.addf %13, %14 : vector<16x128xf32>
    %c0_8 = arith.constant 0 : index
    %c0_9 = arith.constant 0 : index
    %16 = vector.load %arg4[%c0_8, %c0_9] : memref<16x128xf32, #tpu.memory_space<vmem>>, vector<16x128xf32>
    tpu.vector_store %arg4[%c0_8, %c0_9], %15 {strides = array<i32>} : memref<16x128xf32, #tpu.memory_space<vmem>>, vector<16x128xf32>,
    return
  }
  func.func @transform_0(%arg0: i32) -> (i32, i32) {
    %c0_i32 = arith.constant 0 : i32
    %c0_i32_0 = arith.constant 0 : i32
    return %arg0, %c0_i32 : i32, i32
  }
  func.func @transform_1(%arg0: i32) -> (i32, i32) {
    %c0_i32 = arith.constant 0 : i32
    %c0_i32_0 = arith.constant 0 : i32
    %c0_i32_1 = arith.constant 0 : i32
    return %c0_i32, %c0_i32_0 : i32, i32
  }
  func.func @transform_2(%arg0: i32) -> (i32, i32) {
    %c0_i32 = arith.constant 0 : i32
    %c0_i32_0 = arith.constant 0 : i32
    %c0_i32_1 = arith.constant 0 : i32
    return %c0_i32, %c0_i32_0 : i32, i32
  }
  func.func @transform_3(%arg0: i32) -> (i32, i32) {
    %c0_i32 = arith.constant 0 : i32
    %c0_i32_0 = arith.constant 0 : i32
    return %arg0, %c0_i32 : i32, i32
  }
}

</mosaic_0001>

<bundles_post_ra>
// kernel: tpu_custom_call.1
= control target key start
LH: loop header
LB: loop body
LE: loop exit
PB: predicated region body
PF: predicated region fallthrough
CT: control target
= control target key end

     0   :  { %8 = vsyncpa [#allocation3], 0  ;;  %s769_s0 = inlined_call_operand.vmem [shape: f32[88,1], index: 0, kind: input, shape index: {}]   ;;  %s770_s1 = inlined_call_operand.vmem [shape: f32[8,128], index: 1, kind: input, shape index: {}]   ;;  %s771_s2 = inlined_call_operand.vmem [shape: bf16[128,128], index: 2, kind: input, shape index: {}]   ;;  %s772_s3 = inlined_call_operand.hbm [shape: f32[88,128], index: 3, kind: output, shape index: {}]  }
   0x1   :  { %10 = vsyncpa [#allocation3 + $0x1], 0  ;;  %s619_s12 = smov 0   ;;  %s621_s13 = smov 0  }
   0x2   :  { %s623_s14 = smov 0   ;;  %s625_s15 = smov 0  }
   0x3 LB: > { %s640_s16 = sadd.s32 4294967295, %s591_s15   ;;  %s420_s17 = sadd.s32 4294967294, %s591_s15   ;;  %s591_s15 = sphi %s625_s15, %s778_s15   ;;  %s587_s14 = sphi %s623_s14, %s777_s14   ;;  %s583_s13 = sphi %s621_s13, %s776_s13   ;;  %s579_s12 = sphi %s619_s12, %s775_s12  }
   0x4   : > { %s644_s18 = sadd.s32 1, %s591_s15   ;;  %s91_s19 = sadd.s32 1, %s587_s14 }
   0x5   : > { %s88_s20 = ssub.s32 %s591_s15, %s644_s18  ;;  %p101_p0 = scmp.ne.s32.totalorder %s587_s14, %s583_s13 }
   0x6   : > { %p89_p1 = scmp.eq.s32.totalorder %s88_s20, 0  ;;  %p102_p2 = scmp.eq.s32.totalorder %s640_s16, 5 }
   0x7   : > { %p107_p3 = scmp.ne.s32.totalorder %s583_s13, %s579_s12  ;;  %p108_p4 = scmp.eq.s32.totalorder %s420_s17, 5 }
   0x8   : > { %s655_s21 = scalar_select %p89_p1, %s587_s14, %s91_s19  }
   0x9   : > { %p657_p5 = por %p102_p2, %p101_p0  ;;  %p661_p6 = por %p108_p4, %p107_p3 }
   0xa   : > { %p423_p7 = scmp.ge.s32.totalorder %s591_s15, 1  ;;  %p149_p8 = scmp.lt.s32.totalorder %s591_s15, 7 }
   0xc   : > { %p150_p9 = pnand %p423_p7, %p149_p8 }
   0xd   : > { %s668_s24 = sshll.u32 (!%p150_p9), %s640_s16, 1  ;;  %v521_v0 = vld [vmem:[%s771_s2] sm:$0xff] (!%p150_p9)   ;;  %v593_v1 = vmov (!%p150_p9), 0   ;;  %v594_v2 = vmov (!%p150_p9), 0.0   ;;  %v522_v3 = vld [vmem:[%s771_s2 + $0x8] sm:$0xff] (!%p150_p9)   ;;  %v523_v4 = vld [vmem:[%s771_s2 + $0x10] sm:$0xff] (!%p150_p9)  }
   0xe   : > { %153 = sbr.rel (%p150_p9) target bundleno = 411 (0x19b), region = 32  ;;  %520 = vset.pattern.permute.xlu0 (!%p150_p9), %v593_v1  ;;  %p182_p10 = scmp.lt.s32.totalorder (!%p150_p9), %s668_s24, 10  ;;  %457 = vmatprep.subr.bf16.mxu0 (!%p150_p9), %v594_v2  ;;  %v524_v7 = vld [vmem:[%s771_s2 + $0x18] sm:$0xff] (!%p150_p9)   ;;  %v525_v8 = vld [vmem:[%s771_s2 + $0x20] sm:$0xff] (!%p150_p9)   ;;  %vm595_vm0 = vmmov (!%p150_p9), 0   ;;  %v526_v9 = vld [vmem:[%s771_s2 + $0x28] sm:$0xff] (!%p150_p9)  }
   0xf   : > { %458 = vmatpush3.bf16.msra.mxu0 (!%p150_p9), %v521_v0  ;;  %473 = vmatprep.mubr.msk.bf16.mxu0 (!%p150_p9), %vm595_vm0, %v594_v2  ;;  %v527_v10 = vld [vmem:[%s771_s2 + $0x30] sm:$0xff] (!%p150_p9)   ;;  %v528_v11 = vld [vmem:[%s771_s2 + $0x38] sm:$0xff] (!%p150_p9)   ;;  %v427_v12 = vld [vmem:[%s770_s1] ss:$0 sm:$0xff] (!%p150_p9)  ;;  %s174_s6 = sand.u32 (!%p150_p9), 1, %s583_s13  }
  0x10   : > { %459 = vmatprep.subr.bf16.mxu0 (!%p150_p9), %v594_v2  ;;  %v428_v15 = vld [vmem:[%s770_s1 + $0x1] ss:$0 sm:$0xff] (!%p150_p9)  ;;  %s424_s7 = sshll.u32 (!%p150_p9), %s174_s6, 4  ;;  %v429_v23 = vld [vmem:[%s770_s1 + $0x2] ss:$0 sm:$0xff] (!%p150_p9)  ;;  %s709_s11 = scalar_lea.sflag (!%p150_p9), [#allocation3], %s174_s6 }
  0x11   : > { %s176_s10 = scalar_lea.vmem (!%p150_p9), [#allocation2], %s424_s7 }
  0x13   : > { %460 = vmatpush3.bf16.msra.mxu0 (!%p150_p9), %v522_v3 }
  0x14   : > { %461 = vmatprep.subr.bf16.mxu0 (!%p150_p9), %v594_v2 }
  0x15   : > { %s183_s29 = scalar_select %p182_p10, %s668_s24, 10 }
  0x16   : > { %s347_s17 = ssub.s32 (%p657_p5), 11, %s668_s24 }
  0x17   : > { %s426_s30 = sshll.u32 %s183_s29, 3  ;;  %462 = vmatpush3.bf16.msra.mxu0 %v523_v4  ;;  %p348_p11 = scmp.lt.s32.totalorder (%p657_p5), %s347_s17, 2 }
  0x18   : > { %s185_s8 = scalar_lea.vmem %s769_s0, %s426_s30  ;;  %463 = vmatprep.subr.bf16.mxu0 %v594_v2 }
  0x19   : > { %v197_v5 = vld [vmem:[%s185_s8] sm:$0xff]  ;;  %v198_v6 = vld [vmem:[%s185_s8 + $0x8] sm:$0xff] }
  0x1a   : > { %204 = vperm.xlu0 %520, %v197_v5  }
  0x1b   : > { %464 = vmatpush3.bf16.msra.mxu0 %v524_v7 }
  0x1c   : > { %465 = vmatprep.subr.bf16.mxu0 %v594_v2 }
  0x1e   : > { %209 = vperm.xlu0 %520, %v198_v6  }
  0x1f   : > { %466 = vmatpush3.bf16.msra.mxu0 %v525_v8 }
  0x20   : > { %467 = vmatprep.subr.bf16.mxu0 %v594_v2 }
  0x23   : > { %468 = vmatpush3.bf16.msra.mxu0 %v526_v9 }
  0x24   : > { %469 = vmatprep.subr.bf16.mxu0 %v594_v2 }
  0x27   : > { %470 = vmatpush3.bf16.msra.mxu0 %v527_v10 }
  0x28   : > { %471 = vmatprep.subr.bf16.mxu0 %v594_v2 }
  0x2b   : > { %472 = vmatpush3.bf16.msra.mxu0 %v528_v11 }
  0x99   : > { %v205_v13 = vpop.permute.xlu0 %204 }
  0x9a   : > { %v216_v14 = vmul.f32 %v427_v12, %v205_v13 }
  0x9c   : > { %v222_v17 = vadd.f32 %v428_v15, %v216_v14 }
  0x9d   : > { %v210_v16 = vpop.permute.xlu0 %209 }
  0x9e   : > { %v217_v18 = vmul.f32 %v427_v12, %v210_v16  ;;  %v224_v20 = vmax.f32 %v222_v17, 0.0 }
  0xa0   : > { %v223_v19 = vadd.f32 %v428_v15, %v217_v18 }
  0xa2   : > { %v225_v21 = vmax.f32 %v223_v19, 0.0 }
  0xa4   : > { %v226_v22 = vpack.c.bf16 %v225_v21, %v224_v20 }
  0xa6   : > { %474 = vmatmul.mubr.bf16.vlgmr.msra.gmra.mrb[0].mxu0 %v226_v22 }
 0x178   : > { %345 = sbr.rel (!%p657_p5) target bundleno = 411 (0x19b), region = 36 }
 0x179   : > { %v329_v24 = vpop.f32.mrb[0].mxu0 }
 0x17a   : > { %v330_v25 = vadd.f32 %v429_v23, %v329_v24  ;;  %v475_v26 = vpop.f32.mrb[1].mxu0 }
 0x17b   : > { %v332_v27 = vpop.f32.mrb[2].mxu0 }
 0x17c   : > { %336 = vst [vmem:[%s176_s10] sm:$0xff] %v330_v25  ;;  %v333_v28 = vadd.f32 %v429_v23, %v332_v27  ;;  %v476_v29 = vpop.f32.mrb[3].mxu0 }
 0x17e   : > { %337 = vst [vmem:[%s176_s10 + $0x8] sm:$0xff] %v333_v28 }
 0x17f   : > { %s780_s17 = smov (!%p348_p11, %s347_s17), 2 }
 0x180   : > { %s714_s19 = sshll.u32 %s780_s17, 7 }
 0x181   : > { %s352_s20 = ssub.s32 256, %s714_s19 }
 0x182   : > { %353 = vsyncadd %s709_s11, %s352_s20  ;;  %p441_p12 = scmp.ne.s32.totalorder %s714_s19, 0  ;;  %s447_s25 = sshll.u32 %s640_s16, 8 }
 0x183   : > { %s723_s22 = scalar_lea.hbm %s772_s3, %s447_s25  ;;  %s358_s28 = sshll.u32 %s176_s10, 4  ;;  %s725_s28 = int_to_ptr.vmem [resolvable:$true] %s358_s28 }
 0x184   : > { %s529_s24 = scalar_lea.vmem %s725_s28, %s714_s19  ;;  %s596_s29 = smov [#allocation2]  }
 0x185   : > { %p530_p13 = scmp.ne.s32.totalorder %s725_s28, %s529_s24  ;;  %s533_s30 = sshll.u32 %s596_s29, 4  ;;  %s534_s30 = int_to_ptr.vmem [resolvable:$false] %s533_s30 }
 0x186   : > { %s535_s16 = scalar_lea.vmem %s534_s30, 512  ;;  %p536_p2 = scmp.lt.s32.totalorder %s725_s28, %s534_s30 }
 0x187   : > { %p531_p0 = pnand %p530_p13, %p441_p12  ;;  %p537_p3 = scmp.lt.s32.totalorder %s535_s16, %s529_s24 }
 0x189   : > { %p532_p1 = pneg %p531_p0  ;;  %p538_p4 = por %p537_p3, %p536_p2 }
 0x18b   : > { %p539_p5 = pnand %p538_p4, %p532_p1 }
 0x18d   : > { %542 = shalt.err (!%p539_p5)
}
 0x18e   : > { %s543_s4 = scalar_lea.hbm %s723_s22, %s714_s19  ;;  %s547_s7 = scalar_lea.hbm %s772_s3, 1408 }
 0x18f   : > { %p544_p7 = scmp.ne.s32.totalorder %s723_s22, %s543_s4  ;;  %p548_p10 = scmp.lt.u32.totalorder %s723_s22, %s772_s3 }
 0x190   : > { %p549_p11 = scmp.lt.u32.totalorder %s547_s7, %s543_s4  ;;  %p551_p0 = scmp.lt.u32.totalorder %s543_s4, %s723_s22 }
 0x191   : > { %p545_p8 = pnand %p544_p7, %p441_p12 }
 0x192   : > { %p550_p13 = por %p549_p11, %p548_p10 }
 0x193   : > { %p546_p9 = pneg %p545_p8 }
 0x194   : > { %p552_p1 = por %p551_p0, %p550_p13 }
 0x196   : > { %p553_p2 = pnand %p552_p1, %p546_p9 }
 0x198   : > { %556 = shalt.err (!%p553_p2)
}
 0x199   : > { %s597_s10 = smov 128   ;;  %s598_s17 = smov 8  }
 0x19a   : > { %364 = dma.vmem_to_hbm [thread:$0]  (%p441_p12), %s725_s28, %s714_s19, %s723_s22, %s709_s11, %s597_s10, %s597_s10, %s598_s17  }
 0x19b PF: > { %p482_p3 = scmp.ge.s32.totalorder %s591_s15, 2  ;;  %s373_s20 = sand.u32 1, %s579_s12  }
 0x19c   : > { %s374_s25 = scalar_lea.sflag [#allocation3], %s373_s20 }
 0x19d   : > { %p479_p4 = pnand %p482_p3, %p661_p6 }
 0x19f   : > { %574 = dma.done.wait (!%p479_p4), %s374_s25, 256  }
 0x1a0   : > { %576 = vsyncadd (!%p479_p4), %s374_s25, 4294967040  ;;  %p13_p5 = scmp.ge.s32.totalorder %s644_s18, 8   ;;  %s775_s12 = smov %s583_s13 }
 0x1a1   : > { %s776_s13 = smov %s587_s14  ;;  %s777_s14 = smov %s655_s21 }
 0x1a2   : > { %s778_s15 = smov %s644_s18  ;;  %15 = sbr.rel (!%p13_p5) target bundleno = 3 (0x3), region = 67 }
 0x1a9   :  { %379 = vsyncpa [#allocation3], 1 }
 0x1aa   :  { %381 = vsyncpa [#allocation3 + $0x1], 1 }

</bundles_post_ra>
